<compile_context>
chip_gen: v7x
topology: tpu7x:2x2x1
jax: 0.10.0
libtpu: 0.0.40
codegen_flags: <defaults>
</compile_context>

<pallas_src>
import functools

import jax
import jax.numpy as jnp
from jax import lax
from jax.experimental import pallas as pl
from jax.experimental.pallas import tpu as pltpu


def _round_up(x, m):
    return ((x + m - 1) // m) * m


def _cdiv(a, b):
    return -(-a // b)


def _focal_loss_kernel(logits_ref, tgt_ref, alphas_ref, out_ref, acc_ref, *,
                       gamma, n_rows, inv_n, tile_n, n_inner, full_tiles,
                       hard_labels, any_masking):
    p = pl.program_id(0)          # core / outer (parallel) axis
    i = pl.program_id(1)          # sample-tile (arbitrary, accumulated) axis

    @pl.when(i == 0)
    def _init():
        acc_ref[...] = jnp.zeros_like(acc_ref)

    x = logits_ref[...].astype(jnp.float32)          # (C, TN) classes on sublanes
    a = alphas_ref[...].astype(jnp.float32)          # (C, 1)

    if hard_labels:
        lbl = tgt_ref[...]                           # (1, TN) int32 labels
        cls = lax.broadcasted_iota(jnp.int32, x.shape, 0)
        t = (cls == lbl).astype(jnp.float32)         # one-hot, built in-kernel
    else:
        t = tgt_ref[...].astype(jnp.float32)         # (C, TN) soft targets

    # Numerically stable log-softmax over classes (sublane axis 0).
    m = jnp.max(x, axis=0, keepdims=True)                        # (1, TN)
    z = x - m
    lse = jnp.log(jnp.sum(jnp.exp(z), axis=0, keepdims=True))    # (1, TN)
    logp = z - lse                                               # (C, TN)

    # Per-sample soft-target cross-entropy, pt, per-sample alpha.
    ce = -jnp.sum(t * logp, axis=0, keepdims=True)               # (1, TN)
    pt = jnp.exp(-ce)                                            # (1, TN)
    alpha = jnp.sum(t * a, axis=0, keepdims=True)                # (1, TN)

    w = 1.0 - pt
    if isinstance(gamma, int) and gamma >= 0:
        if gamma == 0:
            loss = alpha * ce
        else:
            focusing = w
            for _ in range(gamma - 1):                           # gamma=2 -> w*w
                focusing = focusing * w
            loss = alpha * focusing * ce
    else:
        loss = alpha * (w ** jnp.float32(gamma)) * ce            # (1, TN)

    if any_masking:
        g = p * n_inner + i                                      # global tile idx
        # Only tiles overhanging the true batch need the mask; keep the hot
        # loop mask-free. Mask uses a select (NOT a multiply) so garbage in
        # the padded lanes (possibly inf/NaN) never reaches the accumulator.
        @pl.when(g >= full_tiles)
        def _tail():
            col = lax.broadcasted_iota(jnp.int32, loss.shape, 1) + g * tile_n
            acc_ref[...] += jnp.where(col < n_rows, loss, 0.0)

        @pl.when(g < full_tiles)
        def _body():
            acc_ref[...] += loss
    else:
        acc_ref[...] += loss

    @pl.when(i == pl.num_programs(1) - 1)
    def _finalize():
        total = jnp.sum(acc_ref[...], axis=1, keepdims=True) * inv_n   # (1, 1)
        out_ref[...] = jnp.broadcast_to(total, out_ref.shape)          # (1, 128)


def focal_loss(logits, targets, alphas, gamma=2, tile_n=131072,
               transposed=False):
    """Multi-class focal loss.

    logits : (N, C) (or (C, N) if transposed=True); f32 or bf16.
    targets: (N, C) one-hot / soft targets (or (C, N) if transposed=True),
             OR int class labels of shape (N,) -> hard-label fast path.
    alphas : (C,) per-class weights.
    Returns scalar mean focal loss (f32).
    """
    hard = (targets.ndim == 1)
    if transposed:
        c, n = logits.shape
        x = logits
        t = targets.reshape(1, n).astype(jnp.int32) if hard else targets
    else:
        n, c = logits.shape
        # TODO(synk): fuse this (N,C)->(C,N) layout change into the producer;
        # it is an extra HBM pass outside the kernel.
        x = jnp.transpose(logits)                                # (C, N)
        t = (targets.reshape(1, n).astype(jnp.int32) if hard
             else jnp.transpose(targets))                        # (1,N) / (C,N)
    a = alphas.reshape(c, 1).astype(jnp.float32)                 # (C, 1)

    # Tile size: multiple of 128 lanes, as large as VMEM comfortably allows
    # (keep total pipelined VMEM well under v7x's 64 MiB/TC).
    tn = min(int(tile_n), 262144, _round_up(n, 128))
    tn = _round_up(tn, 128)

    tiles = _cdiv(n, tn)                 # real sample tiles
    n_cores = 2 if tiles >= 2 else 1     # v7x megacore split; no-op on 1-TC chips
    n_inner = _cdiv(tiles, n_cores)      # tiles per core (rectangular grid)
    clamp = (n_cores * n_inner) > tiles  # odd tile count -> one duplicate block
    full_tiles = n // tn                 # tiles fully inside the batch
    any_masking = (n_cores * n_inner) > full_tiles

    def col_idx(p, i):
        g = p * n_inner + i
        return jnp.minimum(g, tiles - 1) if clamp else g

    kernel = functools.partial(
        _focal_loss_kernel,
        gamma=gamma, n_rows=n, inv_n=1.0 / float(n), tile_n=tn,
        n_inner=n_inner, full_tiles=full_tiles,
        hard_labels=hard, any_masking=any_masking,
    )

    tgt_block = (1, tn) if hard else (c, tn)

    out = pl.pallas_call(
        kernel,
        out_shape=jax.ShapeDtypeStruct((1, 128 * n_cores), jnp.float32),
        grid=(n_cores, n_inner),
        in_specs=[
            pl.BlockSpec((c, tn), lambda p, i: (0, col_idx(p, i))),   # logits
            pl.BlockSpec(tgt_block, lambda p, i: (0, col_idx(p, i))),  # targets/labels
            pl.BlockSpec((c, 1), lambda p, i: (0, 0)),                # alphas (resident)
        ],
        out_specs=pl.BlockSpec((1, 128), lambda p, i: (0, p)),         # per-core partial
        scratch_shapes=[pltpu.VMEM((1, tn), jnp.float32)],             # running sums
        compiler_params=pltpu.CompilerParams(
            dimension_semantics=("parallel", "arbitrary"),
            vmem_limit_bytes=48 * 1024 * 1024,   # v5e default is only 16 MiB
        ),
    )(x, t, a)

    # Each core broadcast its partial (already divided by N) into its own
    # 128-lane chunk; take lane 0 of each chunk and sum.
    return jnp.sum(out[0, ::128])


def focal_loss_ref(logits, targets, alphas, gamma=2):
    """Pure-JAX reference (mirrors the PyTorch module)."""
    logp = jax.nn.log_softmax(logits.astype(jnp.float32), axis=1)
    ce = -jnp.sum(targets * logp, axis=1)
    pt = jnp.exp(-ce)
    alpha = jnp.sum(targets * alphas[None, :], axis=1)
    return jnp.mean(alpha * (1.0 - pt) ** gamma * ce)


if __name__ == "__main__":
    key = jax.random.PRNGKey(0)
    k1, k2, k3 = jax.random.split(key, 3)

    C = 6
    gamma = 2
    alphas = jnp.array([0.25, 0.5, 0.75, 1.0, 1.25, 1.5], dtype=jnp.float32)

    # --- test 1: tiny batch, single tile, soft (one-hot) targets ---
    N1 = 8
    logits1 = jax.random.normal(k1, (N1, C), dtype=jnp.float32)
    cls1 = jax.random.randint(k2, (N1,), 0, C)
    targets1 = jax.nn.one_hot(cls1, C, dtype=jnp.float32)

    out1 = jax.block_until_ready(focal_loss(logits1, targets1, alphas, gamma=gamma))
    ref1 = focal_loss_ref(logits1, targets1, alphas, gamma=gamma)
    assert jnp.allclose(out1, ref1, atol=1e-5, rtol=1e-4), (out1, ref1)

    # --- test 2: ragged multi-tile batch with small tiles, exercising the
    #     2-wide parallel axis, duplicate-block clamping, tail mask, and the
    #     hard-label fast path ---
    N2 = 300
    logits2 = jax.random.normal(k3, (N2, C), dtype=jnp.float32)
    cls2 = jax.random.randint(k2, (N2,), 0, C)
    targets2 = jax.nn.one_hot(cls2, C, dtype=jnp.float32)
    ref2 = focal_loss_ref(logits2, targets2, alphas, gamma=gamma)

    out2_soft = jax.block_until_ready(
        focal_loss(logits2, targets2, alphas, gamma=gamma, tile_n=128))
    assert jnp.allclose(out2_soft, ref2, atol=1e-5, rtol=1e-4), (out2_soft, ref2)

    out2_hard = jax.block_until_ready(
        focal_loss(logits2, cls2.astype(jnp.int32), alphas, gamma=gamma, tile_n=128))
    assert jnp.allclose(out2_hard, ref2, atol=1e-5, rtol=1e-4), (out2_hard, ref2)

    print("KERNEL_OK")
</pallas_src>

<mosaic_0001>
module attributes {stable_mosaic.version = 11 : i64} {
  func.func @_focal_loss_kernel(%arg0: i32, %arg1: i32, %arg2: memref<6x128xf32, #tpu.memory_space<vmem>>, %arg3: memref<6x128xf32, #tpu.memory_space<vmem>>, %arg4: memref<6x1xf32, #tpu.memory_space<vmem>>, %arg5: memref<1x128xf32, #tpu.memory_space<vmem>>, %arg6: memref<1x128xf32, #tpu.memory_space<vmem>>) attributes {dimension_semantics = [#tpu.dimension_semantics<parallel>, #tpu.dimension_semantics<arbitrary>], iteration_bounds = array<i64: 1, 1>, scalar_prefetch = 0 : i64, scratch_operands = 1 : i64, tpu.core_type = #tpu.core_type<tc>, window_params = [{transform_indices = @transform_0, window_bounds = array<i64: 6, 128>}, {transform_indices = @transform_1, window_bounds = array<i64: 6, 128>}, {pipeline_mode = #tpu.pipeline_mode<synchronous>, transform_indices = @transform_2, window_bounds = array<i64: 6, 1>}, {transform_indices = @transform_3, window_bounds = array<i64: 1, 128>}]} {
    %c0_i32 = arith.constant 0 : i32
    %0 = arith.cmpi eq, %arg1, %c0_i32 : i32
    %1 = arith.extui %0 : i1 to i32
    %c0_i32_0 = arith.constant 0 : i32
    %2 = arith.cmpi ne, %1, %c0_i32_0 : i32
    scf.if %2 {
      %cst_18 = arith.constant 0.000000e+00 : f32
      %44 = vector.broadcast %cst_18 : f32 to vector<1x128xf32>
      %c0_19 = arith.constant 0 : index
      %c0_20 = arith.constant 0 : index
      %45 = vector.load %arg6[%c0_19, %c0_20] : memref<1x128xf32, #tpu.memory_space<vmem>>, vector<1x128xf32>
      tpu.vector_store %arg6[%c0_19, %c0_20], %44 {strides = array<i32>} : memref<1x128xf32, #tpu.memory_space<vmem>>, vector<1x128xf32>,
    } else {
    }
    %c0 = arith.constant 0 : index
    %c0_1 = arith.constant 0 : index
    %3 = vector.load %arg2[%c0, %c0_1] : memref<6x128xf32, #tpu.memory_space<vmem>>, vector<6x128xf32>
    %c0_2 = arith.constant 0 : index
    %c0_3 = arith.constant 0 : index
    %4 = vector.load %arg4[%c0_2, %c0_3] : memref<6x1xf32, #tpu.memory_space<vmem>>, vector<6x1xf32>
    %c0_4 = arith.constant 0 : index
    %c0_5 = arith.constant 0 : index
    %5 = vector.load %arg3[%c0_4, %c0_5] : memref<6x128xf32, #tpu.memory_space<vmem>>, vector<6x128xf32>
    %cst = arith.constant dense<0xFF800000> : vector<128xf32>
    %6 = vector.multi_reduction <maximumf>, %3, %cst [0] : vector<6x128xf32> to vector<128xf32>
    %7 = vector.shape_cast %6 : vector<128xf32> to vector<1x128xf32>
    %8 = vector.broadcast %7 : vector<1x128xf32> to vector<6x128xf32>
    %9 = arith.subf %3, %8 : vector<6x128xf32>
    %10 = math.exp %9 : vector<6x128xf32>
    %cst_6 = arith.constant dense<0.000000e+00> : vector<128xf32>
    %11 = vector.multi_reduction <add>, %10, %cst_6 [0] : vector<6x128xf32> to vector<128xf32>
    %12 = vector.shape_cast %11 : vector<128xf32> to vector<1x128xf32>
    %13 = math.log %12 : vector<1x128xf32>
    %14 = vector.broadcast %13 : vector<1x128xf32> to vector<6x128xf32>
    %15 = arith.subf %9, %14 : vector<6x128xf32>
    %16 = arith.mulf %5, %15 : vector<6x128xf32>
    %cst_7 = arith.constant dense<0.000000e+00> : vector<128xf32>
    %17 = vector.multi_reduction <add>, %16, %cst_7 [0] : vector<6x128xf32> to vector<128xf32>
    %18 = vector.shape_cast %17 : vector<128xf32> to vector<1x128xf32>
    %cst_8 = arith.constant 0.000000e+00 : f32
    %19 = vector.broadcast %cst_8 : f32 to vector<1x128xf32>
    %20 = arith.subf %19, %18 : vector<1x128xf32>
    %cst_9 = arith.constant 0.000000e+00 : f32
    %21 = vector.broadcast %cst_9 : f32 to vector<1x128xf32>
    %22 = arith.subf %21, %20 : vector<1x128xf32>
    %23 = math.exp %22 : vector<1x128xf32>
    %24 = vector.broadcast %4 : vector<6x1xf32> to vector<6x128xf32>
    %25 = arith.mulf %5, %24 : vector<6x128xf32>
    %cst_10 = arith.constant dense<0.000000e+00> : vector<128xf32>
    %26 = vector.multi_reduction <add>, %25, %cst_10 [0] : vector<6x128xf32> to vector<128xf32>
    %27 = vector.shape_cast %26 : vector<128xf32> to vector<1x128xf32>
    %cst_11 = arith.constant 1.000000e+00 : f32
    %28 = vector.broadcast %cst_11 : f32 to vector<1x128xf32>
    %29 = arith.subf %28, %23 : vector<1x128xf32>
    %30 = arith.mulf %29, %29 : vector<1x128xf32>
    %31 = arith.mulf %27, %30 : vector<1x128xf32>
    %32 = arith.mulf %31, %20 : vector<1x128xf32>
    %c1_i32 = arith.constant 1 : i32
    %33 = arith.muli %arg0, %c1_i32 : i32
    %34 = arith.addi %33, %arg1 : i32
    %c0_i32_12 = arith.constant 0 : i32
    %35 = arith.cmpi sge, %34, %c0_i32_12 : i32
    %36 = arith.extui %35 : i1 to i32
    %c0_i32_13 = arith.constant 0 : i32
    %37 = arith.cmpi ne, %36, %c0_i32_13 : i32
    scf.if %37 {
      %44 = tpu.iota {dimensions = array<i32: 1>} : vector<1x128xi32>
      %c128_i32 = arith.constant 128 : i32
      %45 = arith.muli %34, %c128_i32 : i32
      %46 = vector.broadcast %45 : i32 to vector<1x128xi32>
      %47 = arith.addi %44, %46 : vector<1x128xi32>
      %c0_18 = arith.constant 0 : index
      %c0_19 = arith.constant 0 : index
      %48 = vector.load %arg6[%c0_18, %c0_19] : memref<1x128xf32, #tpu.memory_space<vmem>>, vector<1x128xf32>
      %c8_i32 = arith.constant 8 : i32
      %49 = vector.broadcast %c8_i32 : i32 to vector<1x128xi32>
      %50 = arith.cmpi slt, %47, %49 : vector<1x128xi32>
      %cst_20 = arith.constant 0.000000e+00 : f32
      %51 = vector.broadcast %cst_20 : f32 to vector<1x128xf32>
      %52 = arith.select %50, %32, %51 : vector<1x128xi1>, vector<1x128xf32>
      %53 = arith.addf %48, %52 : vector<1x128xf32>
      %c0_21 = arith.constant 0 : index
      %c0_22 = arith.constant 0 : index
      %54 = vector.load %arg6[%c0_21, %c0_22] : memref<1x128xf32, #tpu.memory_space<vmem>>, vector<1x128xf32>
      tpu.vector_store %arg6[%c0_21, %c0_22], %53 {strides = array<i32>} : memref<1x128xf32, #tpu.memory_space<vmem>>, vector<1x128xf32>,
    } else {
    }
    %c0_i32_14 = arith.constant 0 : i32
    %38 = arith.cmpi slt, %34, %c0_i32_14 : i32
    %39 = arith.extui %38 : i1 to i32
    %c0_i32_15 = arith.constant 0 : i32
    %40 = arith.cmpi ne, %39, %c0_i32_15 : i32
    scf.if %40 {
      %c0_18 = arith.constant 0 : index
      %c0_19 = arith.constant 0 : index
      %44 = vector.load %arg6[%c0_18, %c0_19] : memref<1x128xf32, #tpu.memory_space<vmem>>, vector<1x128xf32>
      %45 = arith.addf %44, %32 : vector<1x128xf32>
      %c0_20 = arith.constant 0 : index
      %c0_21 = arith.constant 0 : index
      %46 = vector.load %arg6[%c0_20, %c0_21] : memref<1x128xf32, #tpu.memory_space<vmem>>, vector<1x128xf32>
      tpu.vector_store %arg6[%c0_20, %c0_21], %45 {strides = array<i32>} : memref<1x128xf32, #tpu.memory_space<vmem>>, vector<1x128xf32>,
    } else {
    }
    %c0_i32_16 = arith.constant 0 : i32
    %41 = arith.cmpi eq, %arg1, %c0_i32_16 : i32
    %42 = arith.extui %41 : i1 to i32
    %c0_i32_17 = arith.constant 0 : i32
    %43 = arith.cmpi ne, %42, %c0_i32_17 : i32
    scf.if %43 {
      %c0_18 = arith.constant 0 : index
      %c0_19 = arith.constant 0 : index
      %44 = vector.load %arg6[%c0_18, %c0_19] : memref<1x128xf32, #tpu.memory_space<vmem>>, vector<1x128xf32>
      %cst_20 = arith.constant dense<0.000000e+00> : vector<1xf32>
      %45 = vector.multi_reduction <add>, %44, %cst_20 [1] : vector<1x128xf32> to vector<1xf32>
      %46 = vector.shape_cast %45 : vector<1xf32> to vector<1x1xf32>
      %cst_21 = arith.constant 1.250000e-01 : f32
      %47 = vector.broadcast %cst_21 : f32 to vector<1x1xf32>
      %48 = arith.mulf %46, %47 : vector<1x1xf32>
      %49 = vector.shape_cast %48 : vector<1x1xf32> to vector<1x1xf32>
      %50 = vector.broadcast %49 : vector<1x1xf32> to vector<1x128xf32>
      %c0_22 = arith.constant 0 : index
      %c0_23 = arith.constant 0 : index
      %51 = vector.load %arg5[%c0_22, %c0_23] : memref<1x128xf32, #tpu.memory_space<vmem>>, vector<1x128xf32>
      tpu.vector_store %arg5[%c0_22, %c0_23], %50 {strides = array<i32>} : memref<1x128xf32, #tpu.memory_space<vmem>>, vector<1x128xf32>,
    } else {
    }
    return
  }
  func.func @transform_0(%arg0: i32, %arg1: i32) -> (i32, i32) {
    %c1_i32 = arith.constant 1 : i32
    %0 = arith.muli %arg0, %c1_i32 : i32
    %1 = arith.addi %0, %arg1 : i32
    %c0_i32 = arith.constant 0 : i32
    %c0_i32_0 = arith.constant 0 : i32
    return %c0_i32, %1 : i32, i32
  }
  func.func @transform_1(%arg0: i32, %arg1: i32) -> (i32, i32) {
    %c1_i32 = arith.constant 1 : i32
    %0 = arith.muli %arg0, %c1_i32 : i32
    %1 = arith.addi %0, %arg1 : i32
    %c0_i32 = arith.constant 0 : i32
    %c0_i32_0 = arith.constant 0 : i32
    return %c0_i32, %1 : i32, i32
  }
  func.func @transform_2(%arg0: i32, %arg1: i32) -> (i32, i32) {
    %c0_i32 = arith.constant 0 : i32
    %c0_i32_0 = arith.constant 0 : i32
    %c0_i32_1 = arith.constant 0 : i32
    return %c0_i32, %c0_i32_0 : i32, i32
  }
  func.func @transform_3(%arg0: i32, %arg1: i32) -> (i32, i32) {
    %c0_i32 = arith.constant 0 : i32
    %c0_i32_0 = arith.constant 0 : i32
    return %c0_i32, %arg0 : i32, i32
  }
}

</mosaic_0001>

<bundles_post_ra>
// kernel: tpu_custom_call.1
= control target key start
LH: loop header
LB: loop body
LE: loop exit
PB: predicated region body
PF: predicated region fallthrough
CT: control target
= control target key end

     0   :  { %8 = vsyncpa [#allocation4], 0  ;;  %s276_s0 = inlined_call_operand.vmem [shape: f32[6,8], index: 0, kind: input, shape index: {}]   ;;  %s277_s1 = inlined_call_operand.hbm [shape: f32[6,8], index: 1, kind: input, shape index: {}]   ;;  %s278_s2 = inlined_call_operand.vmem [shape: f32[6,1], index: 2, kind: input, shape index: {}]   ;;  %s279_s3 = inlined_call_operand.hbm [shape: f32[1,128], index: 3, kind: output, shape index: {}]  }
   0x1   :  { %9 = vsyncpa [#allocation5], 0  ;;  %s218_s12 = smov [#allocation3]   ;;  %s170_s16 = scalar_lea.hbm %s277_s1, 128 }
   0x2   :  { %s27_s13 = sshll.u32 %s218_s12, 4  ;;  %p171_p0 = scmp.ne.s32.totalorder %s277_s1, %s170_s16  ;;  %s28_s13 = int_to_ptr.vmem [resolvable:$true] %s27_s13 }
   0x3   :  { %p174_p1 = scmp.lt.u32.totalorder %s170_s16, %s277_s1 }
   0x5   :  { %p176_p2 = pnand %p174_p1, %p171_p0 }
   0x7   :  { %179 = shalt.err (!%p176_p2)
}
   0x8   :  { %s180_s21 = scalar_lea.vmem %s28_s13, 128  ;;  %p185_p4 = scmp.lt.s32.totalorder %s28_s13, %s28_s13 }
   0x9   :  { %p181_p3 = scmp.ne.s32.totalorder %s28_s13, %s180_s21  ;;  %p186_p5 = scmp.lt.s32.totalorder %s180_s21, %s180_s21 }
   0xb   :  { %p187_p6 = por %p186_p5, %p185_p4 }
   0xd   :  { %p188_p7 = pnand %p187_p6, %p181_p3 }
   0xf   :  { %191 = shalt.err (!%p188_p7)
}
  0x10   :  { %30 = dma.hbm_to_vmem [thread:$0]  %s277_s1, 128, %s28_s13, [#allocation4]  }
  0x11   :  { %214 = dma.done.wait [#allocation4], 128  }
  0x12   :  { %215 = vsyncadd [#allocation4], 4294967168  ;;  %v219_v0 = vmov 0.0   ;;  %v220_v1 = vmov 0   ;;  %vm56_vm0 = vcmask 1045504   ;;  %v111_v44 = vlaneseq }
  0x13   :  { %52 = vst [vmem:[#allocation2] sm:$0x1] %v219_v0  ;;  %163 = vset.pattern.permute.xlu0 %v220_v1  ;;  %v54_v2 = vld [vmem:[%s278_s2] sm:$0x3f]  ;;  %vm132_vm2 = vcmask 1040384  }
  0x14   :  { %v53_v3 = vld [vmem:[%s276_s0] sm:$0x3f]  ;;  %91 = vperm.xlu0 %163, %v54_v2   ;;  %v112_v48 = vand.u32 127, %v111_v44  ;;  %s221_s0 = smov [#allocation6]  }
  0x15   :  { %v57_v4 = vsel %vm56_vm0, %v53_v3, -inf  ;;  %v55_v24 = vld [vmem:[#allocation3] sm:$0x3f]  ;;  %s144_s1 = sshll.u32 %s221_s0, 4  ;;  %s145_s1 = int_to_ptr.vmem [resolvable:$true] %s144_s1 }
  0x16   :  { %v58_v5 = vrot.slane %v57_v4, 4  ;;  %vm117_vm1 = vcmp.lt.s32.totalorder %v112_v48, 8  ;;  %s192_s2 = scalar_lea.vmem %s145_s1, 16  ;;  %s196_s28 = scalar_lea.vmem %s145_s1, 32 }
  0x17   :  { %p193_p8 = scmp.ne.s32.totalorder %s145_s1, %s192_s2  ;;  %p197_p9 = scmp.lt.s32.totalorder %s145_s1, %s145_s1 }
  0x18   :  { %v59_v6 = vmax.f32 %v57_v4, %v58_v5  ;;  %p198_p10 = scmp.lt.s32.totalorder %s196_s28, %s192_s2 }
  0x1a   :  { %v60_v7 = vrot.slane %v59_v6, 2  ;;  %v116_v52 = vld [vmem:[#allocation2] sm:$0x1]  ;;  %p199_p11 = por %p198_p10, %p197_p9 }
  0x1c   :  { %v61_v8 = vmax.f32 %v59_v6, %v60_v7  ;;  %p200_p12 = pnand %p199_p11, %p193_p8 }
  0x1e   :  { %v62_v9 = vrot.slane %v61_v8, 1 }
  0x20   :  { %v63_v10 = vmax.f32 %v61_v8, %v62_v9 }
  0x22   :  { %v64_v11 = vsub.f32 %v53_v3, %v63_v10 }
  0x24   :  { %v65_v12 = vmul.f32 1.442695, %v64_v11 }
  0x26   :  { %164 = vpow2.f32 %v65_v12 }
  0x30   :  { %v165_v13 = vpop.eup %164 }
  0x31   :  { %v67_v14 = vsel %vm56_vm0, %v165_v13, 0.0 }
  0x32   :  { %v68_v15 = vrot.slane %v67_v14, 4 }
  0x34   :  { %v69_v16 = vadd.f32 %v68_v15, %v67_v14 }
  0x36   :  { %v70_v17 = vrot.slane %v69_v16, 2 }
  0x38   :  { %v71_v18 = vadd.f32 %v70_v17, %v69_v16 }
  0x3a   :  { %v72_v19 = vrot.slane %v71_v18, 1 }
  0x3c   :  { %v73_v20 = vadd.f32 %v72_v19, %v71_v18 }
  0x3e   :  { %166 = vlog2.f32 %v73_v20 }
  0x48   :  { %v167_v21 = vpop.eup %166 }
  0x49   :  { %v75_v22 = vmul.f32 0.6931472, %v167_v21 }
  0x4b   :  { %v76_v23 = vsub.f32 %v64_v11, %v75_v22 }
  0x4d   :  { %v77_v25 = vmul.f32 %v76_v23, %v55_v24 }
  0x4f   :  { %v78_v26 = vsel %vm56_vm0, %v77_v25, 0.0 }
  0x50   :  { %v79_v27 = vrot.slane %v78_v26, 4 }
  0x52   :  { %v80_v28 = vadd.f32 %v79_v27, %v78_v26 }
  0x54   :  { %v81_v29 = vrot.slane %v80_v28, 2 }
  0x56   :  { %v82_v30 = vadd.f32 %v81_v29, %v80_v28 }
  0x58   :  { %v83_v31 = vrot.slane %v82_v30, 1 }
  0x5a   :  { %v84_v32 = vadd.f32 %v83_v31, %v82_v30 }
  0x5c   :  { %v85_v33 = vsub.f32 0.0, %v84_v32 }
  0x5e   :  { %v86_v34 = vsub.f32 0.0, %v85_v33 }
  0x60   :  { %v87_v35 = vmul.f32 1.442695, %v86_v34 }
  0x62   :  { %168 = vpow2.f32 %v87_v35 }
  0x6c   :  { %v169_v40 = vpop.eup %168 }
  0x6d   :  { %v102_v43 = vsub.f32 1.0, %v169_v40 }
  0x6f   :  { %v103_v47 = vmul.f32 %v102_v43, %v102_v43 }
  0x93   :  { %v92_v36 = vpop.permute.xlu0 %91 }
  0x94   :  { %v94_v37 = vmul.f32 %v92_v36, %v55_v24 }
  0x96   :  { %v95_v38 = vsel %vm56_vm0, %v94_v37, 0.0 }
  0x97   :  { %v96_v39 = vrot.slane %v95_v38, 4 }
  0x99   :  { %v97_v41 = vadd.f32 %v96_v39, %v95_v38 }
  0x9b   :  { %v98_v42 = vrot.slane %v97_v41, 2 }
  0x9d   :  { %v99_v45 = vadd.f32 %v98_v42, %v97_v41 }
  0x9f   :  { %v100_v46 = vrot.slane %v99_v45, 1 }
  0xa1   :  { %v101_v49 = vadd.f32 %v100_v46, %v99_v45 }
  0xa3   :  { %v104_v50 = vmul.f32 %v103_v47, %v101_v49 }
  0xa5   :  { %v105_v51 = vmul.f32 %v104_v50, %v85_v33 }
  0xa7   :  { %v118_v53 = vsel %vm117_vm1, %v105_v51, 0.0 }
  0xa8   :  { %v119_v54 = vadd.f32 %v118_v53, %v116_v52 }
  0xaa   :  { %120 = vst [vmem:[#allocation2] sm:$0x1] %v119_v54 }
  0xb1   :  { %v131_v55 = vld [vmem:[#allocation2] sm:$0x1] }
  0xb2   :  { %v133_v56 = vsel %vm132_vm2, %v131_v55, 0.0 }
  0xb3   :  { %134 = vadd.xlane.f32.xlu0 %v133_v56 }
 0x140   :  { %v135_v57 = vpop.xlane.xlu0 %134 }
 0x141   :  { %v136_v58 = vmul.f32 0.125, %v135_v57 }
 0x143   :  { %137 = vst [vmem:[#allocation6] sm:$0x1] %v136_v58 }
 0x144   :  { %203 = shalt.err (!%p200_p12)
}
 0x145   :  { %s204_s4 = scalar_lea.hbm %s279_s3, 16 }
 0x146   :  { %p205_p13 = scmp.ne.s32.totalorder %s279_s3, %s204_s4  ;;  %p208_p0 = scmp.lt.u32.totalorder %s204_s4, %s279_s3 }
 0x148   :  { %p210_p1 = pnand %p208_p0, %p205_p13 }
 0x14a   :  { %213 = shalt.err (!%p210_p1)
}
 0x14b   :  { %147 = dma.vmem_to_hbm [thread:$0]  %s145_s1, 16, %s279_s3, [#allocation5]  }
 0x14c   :  { %216 = dma.done.wait [#allocation5], 16  }
 0x14d   :  { %217 = vsyncadd [#allocation5], 4294967280 }
 0x14e   :  { %151 = vsyncpa [#allocation4], 1 }
 0x14f   :  { %152 = vsyncpa [#allocation5], 1 }

</bundles_post_ra>
